<compile_context>
chip_gen: v6e
topology: v6e:2x2x1
jax: 0.10.0
libtpu: 0.0.40
codegen_flags: <defaults>
</compile_context>

<pallas_src>
import functools

import jax
import jax.numpy as jnp
from jax import lax
from jax.experimental import pallas as pl
from jax.experimental.pallas import tpu as pltpu


# ----------------------------- kernel ----------------------------------------


def _know_gen_kernel(hidden_ref, ctx_ref, attn_ref, wl_ref, bl_ref, wc_ref,
                     bc_ref, exp_ref, mask_ref, km_ref, out_ref, p_copy_ref,
                     *, vocab):
    # ---- logits + softmax over the (lane-padded) target vocab ---------------
    # pad_idx masking and lane padding are pre-folded into wl/bl, so padded and
    # pad-token columns come out at -1e30 -> exp == 0 exactly.
    logits = jnp.dot(hidden_ref[...], wl_ref[...],
                     preferred_element_type=jnp.float32) + bl_ref[...]
    m = jnp.max(logits, axis=1, keepdims=True)
    e = jnp.exp(logits - m)
    denom = jnp.sum(e, axis=1, keepdims=True)
    prob = e * pl.reciprocal(denom, approx=True)             # EUP slot (approx recip)

    # ---- p_copy = sigmoid(ctx . w_c + b_c)  (VPU mul + lane reduce, no MXU) --
    pc_logit = jnp.sum(ctx_ref[...] * wc_ref[...], axis=1, keepdims=True) + bc_ref[...]
    p_copy = jax.nn.sigmoid(pc_logit)                        # (R, 1)
    p_copy_ref[...] = p_copy

    # ---- vocab part of the fused output --------------------------------------
    out_ref[:, :vocab] = prob[:, :vocab] * (1.0 - p_copy)

    # ---- copy part:  copy[r, :] = sum_s mul_attn[r, s] * know_map[s, r % B, :] --
    # (row tile height R is a multiple of B, so tile-local r % B == global b;
    #  the precomputed mask zeroes every expanded column whose batch != r % B)
    mul_attn = attn_ref[...] * p_copy                        # (R, S)
    ma_exp = jnp.dot(mul_attn, exp_ref[...],
                     preferred_element_type=jnp.float32)     # (R, S*B): col j = attn[:, j // B]
    ma_exp = ma_exp * mask_ref[...]                          # keep batch-matching cols only
    out_ref[:, vocab:] = jnp.dot(ma_exp, km_ref[...],
                                 preferred_element_type=jnp.float32)


# ----------------------------- wrapper ----------------------------------------


def _round_up(x, m):
    return ((x + m - 1) // m) * m


def _choose_row_tile(tlen, batch, streamed_row_bytes, work_row_bytes,
                     resident_bytes, budget=24 << 20):
    """Rows per grid step = t_tile * batch with t_tile | tlen, sublane-aligned
    (multiple of 8 or the full N); working set kept within a VMEM budget."""
    n = tlen * batch
    cands = [t * batch for t in range(1, tlen + 1)
             if tlen % t == 0 and (t * batch % 8 == 0 or t * batch == n)]
    fitting = [r for r in cands
               if 2 * r * streamed_row_bytes + r * work_row_bytes + resident_bytes
               <= budget]
    return max(fitting) if fitting else min(cands)


@functools.partial(jax.jit, static_argnames=("pad_idx",))
def know_generator_forward(hidden, know_attn, know_map, context_vecs,
                           W_l, b_l, W_c, b_c, pad_idx):
    """Returns (cat([out_prob, copy_prob], axis=1), p_copy) — same as torch forward."""
    N, D = hidden.shape
    _, S = know_attn.shape
    S_, B, CV = know_map.shape
    assert S == S_ and N % B == 0
    C = context_vecs.shape[1]
    V = W_l.shape[1]
    tlen = N // B

    # Fold pad-token masking into the weights (zero column, -1e30 bias) and pad
    # the target-vocab dimension to a 128-lane multiple (zero weights, -1e30 bias)
    # -> pad/padded columns contribute exp(.) == 0 to the softmax, no in-kernel mask.
    Vp = _round_up(V, 128)
    W_lp = W_l.at[:, pad_idx].set(0.0)
    b_lp = b_l.at[pad_idx].set(-1e30)
    if Vp != V:
        W_lp = jnp.pad(W_lp, ((0, 0), (0, Vp - V)))
        b_lp = jnp.pad(b_lp, (0, Vp - V), constant_values=-1e30)

    # Free contiguous reshape (no transpose): row j of km2 is know_map[j // B, j % B, :].
    km2 = know_map.reshape(S * B, CV)
    # Static expansion matrix so that (attn @ E)[r, s*B + b] == attn[r, s].
    E = jnp.repeat(jnp.eye(S, dtype=jnp.float32), B, axis=1)

    W_out = V + CV
    streamed_row_bytes = 4 * (D + C + S + W_out + 1 + S * B)    # tiles + mask
    work_row_bytes = 4 * (3 * Vp + 2 * S * B + S + CV)          # in-body intermediates
    resident_bytes = 4 * (D * Vp + Vp + C + 1 + S * S * B + S * B * CV)
    R = _choose_row_tile(tlen, B, streamed_row_bytes, work_row_bytes, resident_bytes)
    grid = (N // R,)

    # Precomputed batch-alignment mask for one row tile (same for every tile since
    # R is a multiple of B): mask[r, j] = 1 iff j % B == r % B.
    mask = (jnp.arange(R)[:, None] % B == jnp.arange(S * B)[None, :] % B
            ).astype(jnp.float32)

    kernel = functools.partial(_know_gen_kernel, vocab=V)
    out, p_copy = pl.pallas_call(
        kernel,
        out_shape=(jax.ShapeDtypeStruct((N, W_out), jnp.float32),
                   jax.ShapeDtypeStruct((N, 1), jnp.float32)),
        grid=grid,
        in_specs=[
            pl.BlockSpec((R, D), lambda i: (i, 0)),        # hidden tile (streamed)
            pl.BlockSpec((R, C), lambda i: (i, 0)),        # context tile (streamed)
            pl.BlockSpec((R, S), lambda i: (i, 0)),        # attention tile (streamed)
            pl.BlockSpec((D, Vp), lambda i: (0, 0)),       # W_l       (resident)
            pl.BlockSpec((1, Vp), lambda i: (0, 0)),       # b_l       (resident)
            pl.BlockSpec((1, C), lambda i: (0, 0)),        # w_copy    (resident)
            pl.BlockSpec((1, 1), lambda i: (0, 0)),        # b_copy    (resident)
            pl.BlockSpec((S, S * B), lambda i: (0, 0)),    # expansion (resident)
            pl.BlockSpec((R, S * B), lambda i: (0, 0)),    # batch mask (resident)
            pl.BlockSpec((S * B, CV), lambda i: (0, 0)),   # know_map  (resident)
        ],
        out_specs=(
            pl.BlockSpec((R, W_out), lambda i: (i, 0)),    # fused [out_prob | copy_prob]
            pl.BlockSpec((R, 1), lambda i: (i, 0)),        # p_copy
        ),
        compiler_params=pltpu.CompilerParams(
            dimension_semantics=("parallel",),
            vmem_limit_bytes=32 * 1024 * 1024),
    )(hidden, context_vecs, know_attn, W_lp, b_lp.reshape(1, Vp),
      W_c.reshape(1, C), b_c.reshape(1, 1), E, mask, km2)

    return out, p_copy


# ------------------------- pure-JAX reference ----------------------------------


def reference_forward(hidden, know_attn, know_map, context_vecs,
                      W_l, b_l, W_c, b_c, pad_idx):
    N, _ = hidden.shape
    S, B, CV = know_map.shape
    tlen = N // B
    logits = hidden @ W_l + b_l
    logits = logits.at[:, pad_idx].set(-jnp.inf)
    prob = jax.nn.softmax(logits, axis=1)
    p_copy = jax.nn.sigmoid(context_vecs @ W_c + b_c)
    out_prob = prob * (1.0 - p_copy)
    mul_attn = know_attn * p_copy
    a = jnp.transpose(mul_attn.reshape(tlen, B, S), (1, 0, 2))
    b = jnp.transpose(know_map, (1, 0, 2))
    cp = jnp.transpose(jnp.einsum('bts,bsv->btv', a, b), (1, 0, 2)).reshape(N, CV)
    return jnp.concatenate([out_prob, cp], axis=1), p_copy


# ------------------------------ main --------------------------------------------


if __name__ == "__main__":
    # module config
    input_size = 32
    output_size = 48
    know_size = 16
    pad_idx = 1
    ctx_size = input_size * 2 + know_size   # p_kgen_func == 'linear'

    # data shapes
    batch, tlen, slen, cvocab = 2, 4, 8, 24
    N = batch * tlen

    key = jax.random.PRNGKey(0)
    k = jax.random.split(key, 8)

    # deterministic parameter init (torch.nn.Linear-style uniform)
    bl_lim = 1.0 / jnp.sqrt(input_size)
    bc_lim = 1.0 / jnp.sqrt(ctx_size)
    W_l = jax.random.uniform(k[0], (input_size, output_size), jnp.float32, -bl_lim, bl_lim)
    b_l = jax.random.uniform(k[1], (output_size,), jnp.float32, -bl_lim, bl_lim)
    W_c = jax.random.uniform(k[2], (ctx_size, 1), jnp.float32, -bc_lim, bc_lim)
    b_c = jax.random.uniform(k[3], (1,), jnp.float32, -bc_lim, bc_lim)

    # inputs
    hidden = jax.random.normal(k[4], (N, input_size), jnp.float32)
    know_attn = jax.nn.softmax(jax.random.normal(k[5], (N, slen), jnp.float32), axis=1)
    know_map = (jax.random.uniform(k[6], (slen, batch, cvocab), jnp.float32) > 0.8
                ).astype(jnp.float32)   # sparse indicator matrix
    context_vecs = jax.random.normal(k[7], (N, ctx_size), jnp.float32)

    out, p_copy = know_generator_forward(hidden, know_attn, know_map, context_vecs,
                                         W_l, b_l, W_c, b_c, pad_idx)
    jax.block_until_ready((out, p_copy))

    ref_out, ref_pc = reference_forward(hidden, know_attn, know_map, context_vecs,
                                        W_l, b_l, W_c, b_c, pad_idx)
    assert out.shape == (N, output_size + cvocab)
    assert p_copy.shape == (N, 1)
    # out_prob uses the EUP approximate reciprocal -> looser tolerance than f32 exact.
    assert jnp.allclose(out, ref_out, atol=5e-3, rtol=5e-3)
    assert jnp.allclose(p_copy, ref_pc, atol=1e-5, rtol=1e-5)

    print("KERNEL_OK")
</pallas_src>

<mosaic_0001>
module attributes {stable_mosaic.version = 11 : i64} {
  func.func @_know_gen_kernel(%arg0: i32, %arg1: memref<8x32xf32, #tpu.memory_space<vmem>>, %arg2: memref<8x80xf32, #tpu.memory_space<vmem>>, %arg3: memref<8x8xf32, #tpu.memory_space<vmem>>, %arg4: memref<32x128xf32, #tpu.memory_space<vmem>>, %arg5: memref<1x128xf32, #tpu.memory_space<vmem>>, %arg6: memref<1x80xf32, #tpu.memory_space<vmem>>, %arg7: memref<1x1xf32, #tpu.memory_space<vmem>>, %arg8: memref<8x16xf32, #tpu.memory_space<vmem>>, %arg9: memref<8x16xf32, #tpu.memory_space<vmem>>, %arg10: memref<16x24xf32, #tpu.memory_space<vmem>>, %arg11: memref<8x72xf32, #tpu.memory_space<vmem>>, %arg12: memref<8x1xf32, #tpu.memory_space<vmem>>) attributes {dimension_semantics = [#tpu.dimension_semantics<parallel>], iteration_bounds = array<i64: 1>, scalar_prefetch = 0 : i64, scratch_operands = 0 : i64, tpu.core_type = #tpu.core_type<tc>, window_params = [{transform_indices = @transform_0, window_bounds = array<i64: 8, 32>}, {transform_indices = @transform_1, window_bounds = array<i64: 8, 80>}, {transform_indices = @transform_2, window_bounds = array<i64: 8, 8>}, {pipeline_mode = #tpu.pipeline_mode<synchronous>, transform_indices = @transform_3, window_bounds = array<i64: 32, 128>}, {pipeline_mode = #tpu.pipeline_mode<synchronous>, transform_indices = @transform_4, window_bounds = array<i64: 1, 128>}, {pipeline_mode = #tpu.pipeline_mode<synchronous>, transform_indices = @transform_5, window_bounds = array<i64: 1, 80>}, {pipeline_mode = #tpu.pipeline_mode<synchronous>, transform_indices = @transform_6, window_bounds = array<i64: 1, 1>}, {pipeline_mode = #tpu.pipeline_mode<synchronous>, transform_indices = @transform_7, window_bounds = array<i64: 8, 16>}, {pipeline_mode = #tpu.pipeline_mode<synchronous>, transform_indices = @transform_8, window_bounds = array<i64: 8, 16>}, {pipeline_mode = #tpu.pipeline_mode<synchronous>, transform_indices = @transform_9, window_bounds = array<i64: 16, 24>}, {transform_indices = @transform_10, window_bounds = array<i64: 8, 72>}, {transform_indices = @transform_11, window_bounds = array<i64: 8, 1>}]} {
    %c0 = arith.constant 0 : index
    %c0_0 = arith.constant 0 : index
    %0 = vector.load %arg1[%c0, %c0_0] : memref<8x32xf32, #tpu.memory_space<vmem>>, vector<8x32xf32>
    %c0_1 = arith.constant 0 : index
    %c0_2 = arith.constant 0 : index
    %1 = vector.load %arg4[%c0_1, %c0_2] : memref<32x128xf32, #tpu.memory_space<vmem>>, vector<32x128xf32>
    %cst = arith.constant dense<0.000000e+00> : vector<8x128xf32>
    %2 = tpu.matmul %0, %1, %cst {dimension_numbers = #tpu.dot_dimension_numbers<[1], [0], [0], [1], [0, 0, 1, 1], [], []>} : vector<8x32xf32>, vector<32x128xf32>, vector<8x128xf32> -> vector<8x128xf32>
    %c0_3 = arith.constant 0 : index
    %c0_4 = arith.constant 0 : index
    %3 = vector.load %arg5[%c0_3, %c0_4] : memref<1x128xf32, #tpu.memory_space<vmem>>, vector<1x128xf32>
    %4 = vector.broadcast %3 : vector<1x128xf32> to vector<8x128xf32>
    %5 = arith.addf %2, %4 : vector<8x128xf32>
    %cst_5 = arith.constant dense<0xFF800000> : vector<8xf32>
    %6 = vector.multi_reduction <maximumf>, %5, %cst_5 [1] : vector<8x128xf32> to vector<8xf32>
    %7 = vector.shape_cast %6 : vector<8xf32> to vector<8x1xf32>
    %8 = vector.broadcast %7 : vector<8x1xf32> to vector<8x128xf32>
    %9 = arith.subf %5, %8 : vector<8x128xf32>
    %10 = math.exp %9 : vector<8x128xf32>
    %cst_6 = arith.constant dense<0.000000e+00> : vector<8xf32>
    %11 = vector.multi_reduction <add>, %10, %cst_6 [1] : vector<8x128xf32> to vector<8xf32>
    %12 = vector.shape_cast %11 : vector<8xf32> to vector<8x1xf32>
    %13 = tpu.reciprocal %12 {approx = true} : vector<8x1xf32> -> vector<8x1xf32>
    %14 = vector.broadcast %13 : vector<8x1xf32> to vector<8x128xf32>
    %15 = arith.mulf %10, %14 : vector<8x128xf32>
    %c0_7 = arith.constant 0 : index
    %c0_8 = arith.constant 0 : index
    %16 = vector.load %arg2[%c0_7, %c0_8] : memref<8x80xf32, #tpu.memory_space<vmem>>, vector<8x80xf32>
    %c0_9 = arith.constant 0 : index
    %c0_10 = arith.constant 0 : index
    %17 = vector.load %arg6[%c0_9, %c0_10] : memref<1x80xf32, #tpu.memory_space<vmem>>, vector<1x80xf32>
    %18 = vector.broadcast %17 : vector<1x80xf32> to vector<8x80xf32>
    %19 = arith.mulf %16, %18 : vector<8x80xf32>
    %cst_11 = arith.constant dense<0.000000e+00> : vector<8xf32>
    %20 = vector.multi_reduction <add>, %19, %cst_11 [1] : vector<8x80xf32> to vector<8xf32>
    %21 = vector.shape_cast %20 : vector<8xf32> to vector<8x1xf32>
    %c0_12 = arith.constant 0 : index
    %c0_13 = arith.constant 0 : index
    %22 = vector.load %arg7[%c0_12, %c0_13] : memref<1x1xf32, #tpu.memory_space<vmem>>, vector<1x1xf32>
    %23 = vector.broadcast %22 : vector<1x1xf32> to vector<8x1xf32>
    %24 = arith.addf %21, %23 : vector<8x1xf32>
    %25 = arith.negf %24 : vector<8x1xf32>
    %26 = math.exp %25 : vector<8x1xf32>
    %cst_14 = arith.constant 1.000000e+00 : f32
    %27 = vector.broadcast %cst_14 : f32 to vector<8x1xf32>
    %28 = arith.addf %27, %26 : vector<8x1xf32>
    %29 = arith.divf %27, %28 : vector<8x1xf32>
    %c0_15 = arith.constant 0 : index
    %c0_16 = arith.constant 0 : index
    %30 = vector.load %arg12[%c0_15, %c0_16] : memref<8x1xf32, #tpu.memory_space<vmem>>, vector<8x1xf32>
    tpu.vector_store %arg12[%c0_15, %c0_16], %29 {strides = array<i32>} : memref<8x1xf32, #tpu.memory_space<vmem>>, vector<8x1xf32>,
    %31 = vector.extract_strided_slice %15 {offsets = [0, 0], sizes = [8, 48], strides = [1, 1]} : vector<8x128xf32> to vector<8x48xf32>
    %cst_17 = arith.constant 1.000000e+00 : f32
    %32 = vector.broadcast %cst_17 : f32 to vector<8x1xf32>
    %33 = arith.subf %32, %29 : vector<8x1xf32>
    %34 = vector.broadcast %33 : vector<8x1xf32> to vector<8x48xf32>
    %35 = arith.mulf %31, %34 : vector<8x48xf32>
    %c0_18 = arith.constant 0 : index
    %c0_19 = arith.constant 0 : index
    %36 = vector.load %arg11[%c0_18, %c0_19] : memref<8x72xf32, #tpu.memory_space<vmem>>, vector<8x48xf32>
    tpu.vector_store %arg11[%c0_18, %c0_19], %35 {strides = array<i32>} : memref<8x72xf32, #tpu.memory_space<vmem>>, vector<8x48xf32>,
    %c0_20 = arith.constant 0 : index
    %c0_21 = arith.constant 0 : index
    %37 = vector.load %arg3[%c0_20, %c0_21] : memref<8x8xf32, #tpu.memory_space<vmem>>, vector<8x8xf32>
    %38 = vector.broadcast %29 : vector<8x1xf32> to vector<8x8xf32>
    %39 = arith.mulf %37, %38 : vector<8x8xf32>
    %c0_22 = arith.constant 0 : index
    %c0_23 = arith.constant 0 : index
    %40 = vector.load %arg8[%c0_22, %c0_23] : memref<8x16xf32, #tpu.memory_space<vmem>>, vector<8x16xf32>
    %cst_24 = arith.constant dense<0.000000e+00> : vector<8x16xf32>
    %41 = tpu.matmul %39, %40, %cst_24 {dimension_numbers = #tpu.dot_dimension_numbers<[1], [0], [0], [1], [0, 0, 1, 1], [], []>} : vector<8x8xf32>, vector<8x16xf32>, vector<8x16xf32> -> vector<8x16xf32>
    %c0_25 = arith.constant 0 : index
    %c0_26 = arith.constant 0 : index
    %42 = vector.load %arg9[%c0_25, %c0_26] : memref<8x16xf32, #tpu.memory_space<vmem>>, vector<8x16xf32>
    %43 = arith.mulf %41, %42 : vector<8x16xf32>
    %c0_27 = arith.constant 0 : index
    %c0_28 = arith.constant 0 : index
    %44 = vector.load %arg10[%c0_27, %c0_28] : memref<16x24xf32, #tpu.memory_space<vmem>>, vector<16x24xf32>
    %cst_29 = arith.constant dense<0.000000e+00> : vector<8x24xf32>
    %45 = tpu.matmul %43, %44, %cst_29 {dimension_numbers = #tpu.dot_dimension_numbers<[1], [0], [0], [1], [0, 0, 1, 1], [], []>} : vector<8x16xf32>, vector<16x24xf32>, vector<8x24xf32> -> vector<8x24xf32>
    %c0_30 = arith.constant 0 : index
    %c48 = arith.constant 48 : index
    %46 = vector.load %arg11[%c0_30, %c48] : memref<8x72xf32, #tpu.memory_space<vmem>>, vector<8x24xf32>
    tpu.vector_store %arg11[%c0_30, %c48], %45 {strides = array<i32>} : memref<8x72xf32, #tpu.memory_space<vmem>>, vector<8x24xf32>,
    return
  }
  func.func @transform_0(%arg0: i32) -> (i32, i32) {
    %c0_i32 = arith.constant 0 : i32
    %c0_i32_0 = arith.constant 0 : i32
    return %arg0, %c0_i32 : i32, i32
  }
  func.func @transform_1(%arg0: i32) -> (i32, i32) {
    %c0_i32 = arith.constant 0 : i32
    %c0_i32_0 = arith.constant 0 : i32
    return %arg0, %c0_i32 : i32, i32
  }
  func.func @transform_2(%arg0: i32) -> (i32, i32) {
    %c0_i32 = arith.constant 0 : i32
    %c0_i32_0 = arith.constant 0 : i32
    return %arg0, %c0_i32 : i32, i32
  }
  func.func @transform_3(%arg0: i32) -> (i32, i32) {
    %c0_i32 = arith.constant 0 : i32
    %c0_i32_0 = arith.constant 0 : i32
    %c0_i32_1 = arith.constant 0 : i32
    return %c0_i32, %c0_i32_0 : i32, i32
  }
  func.func @transform_4(%arg0: i32) -> (i32, i32) {
    %c0_i32 = arith.constant 0 : i32
    %c0_i32_0 = arith.constant 0 : i32
    %c0_i32_1 = arith.constant 0 : i32
    return %c0_i32, %c0_i32_0 : i32, i32
  }
  func.func @transform_5(%arg0: i32) -> (i32, i32) {
    %c0_i32 = arith.constant 0 : i32
    %c0_i32_0 = arith.constant 0 : i32
    %c0_i32_1 = arith.constant 0 : i32
    return %c0_i32, %c0_i32_0 : i32, i32
  }
  func.func @transform_6(%arg0: i32) -> (i32, i32) {
    %c0_i32 = arith.constant 0 : i32
    %c0_i32_0 = arith.constant 0 : i32
    %c0_i32_1 = arith.constant 0 : i32
    return %c0_i32, %c0_i32_0 : i32, i32
  }
  func.func @transform_7(%arg0: i32) -> (i32, i32) {
    %c0_i32 = arith.constant 0 : i32
    %c0_i32_0 = arith.constant 0 : i32
    %c0_i32_1 = arith.constant 0 : i32
    return %c0_i32, %c0_i32_0 : i32, i32
  }
  func.func @transform_8(%arg0: i32) -> (i32, i32) {
    %c0_i32 = arith.constant 0 : i32
    %c0_i32_0 = arith.constant 0 : i32
    %c0_i32_1 = arith.constant 0 : i32
    return %c0_i32, %c0_i32_0 : i32, i32
  }
  func.func @transform_9(%arg0: i32) -> (i32, i32) {
    %c0_i32 = arith.constant 0 : i32
    %c0_i32_0 = arith.constant 0 : i32
    %c0_i32_1 = arith.constant 0 : i32
    return %c0_i32, %c0_i32_0 : i32, i32
  }
  func.func @transform_10(%arg0: i32) -> (i32, i32) {
    %c0_i32 = arith.constant 0 : i32
    %c0_i32_0 = arith.constant 0 : i32
    return %arg0, %c0_i32 : i32, i32
  }
  func.func @transform_11(%arg0: i32) -> (i32, i32) {
    %c0_i32 = arith.constant 0 : i32
    %c0_i32_0 = arith.constant 0 : i32
    return %arg0, %c0_i32 : i32, i32
  }
}

</mosaic_0001>

<bundles_post_ra>
// kernel: know_generator_forward.1
= control target key start
LH: loop header
LB: loop body
LE: loop exit
PB: predicated region body
PF: predicated region fallthrough
CT: control target
= control target key end

     0   :  { %s550_s0 = inlined_call_operand.vmem [shape: f32[8,32], index: 0, kind: input, shape index: {}]   ;;  %s551_s1 = inlined_call_operand.vmem [shape: f32[8,80], index: 1, kind: input, shape index: {}]   ;;  %s552_s2 = inlined_call_operand.vmem [shape: f32[8,8], index: 2, kind: input, shape index: {}]   ;;  %s553_s3 = inlined_call_operand.vmem [shape: f32[32,128], index: 3, kind: input, shape index: {}]   ;;  %s554_s4 = inlined_call_operand.vmem [shape: f32[1,128], index: 4, kind: input, shape index: {}]   ;;  %s555_s5 = inlined_call_operand.vmem [shape: f32[1,80], index: 5, kind: input, shape index: {}]   ;;  %s556_s6 = inlined_call_operand.<no memory space> [shape: f32[1,1], index: 6, kind: input, shape index: {}]   ;;  %s557_s7 = inlined_call_operand.vmem [shape: f32[8,16], index: 7, kind: input, shape index: {}]   ;;  %s558_s8 = inlined_call_operand.vmem [shape: f32[8,16], index: 8, kind: input, shape index: {}]   ;;  %s559_s9 = inlined_call_operand.vmem [shape: f32[16,24], index: 9, kind: input, shape index: {}]   ;;  %s560_s10 = inlined_call_operand.hbm [shape: f32[8,72], index: 10, kind: output, shape index: {0}]   ;;  %s561_s11 = inlined_call_operand.vmem [shape: f32[8,1], index: 11, kind: output, shape index: {1}]  }
   0x1   :  { %v17_v0 = vstv %s556_s6 }
   0x2   :  { %18 = vst [vmem:[#allocation2] sm:$0x1] %v17_v0 }
   0x3   :  { %v44_v1 = vld [vmem:[%s553_s3 + $0x18] sm:$0xff]  ;;  %v135_v2 = vld [vmem:[%s551_s1] sm:$0xff]  ;;  %vm144_vm0 = vcmask 654336   ;;  %v434_v4 = vmov 0.0   ;;  %v43_v6 = vld [vmem:[%s553_s3 + $0x10] sm:$0xff]  ;;  %vm435_vm1 = vmmov 0  }
   0x4   :  { %v359_v3 = vld [vmem:[%s555_s5] ss:$0 sm:$0xff]  ;;  %374 = vmatprep.subr.mxu0 %v434_v4  ;;  %385 = vmatprep.subr.mxu1 %v434_v4 }
   0x5   :  { %v143_v5 = vmul.f32 %v359_v3, %v135_v2  ;;  %375 = vmatpush3.msra.mxu0 %v44_v1  ;;  %382 = vmatprep.mubr.msk.f32.mxu0 %vm435_vm1, %v434_v4 }
   0x6   :  { %19 = vsyncpa [#allocation4], 0  ;;  %376 = vmatprep.subr.mxu0 %v434_v4  ;;  %v42_v8 = vld [vmem:[%s553_s3 + $0x8] sm:$0xff]  ;;  %387 = vmatprep.mubr.msk.f32.mxu1 %vm435_vm1, %v434_v4  ;;  %v41_v9 = vld [vmem:[%s553_s3] sm:$0xff]  ;;  %vm52_vm2 = vcmask 261120   ;;  %v436_v11 = vmov 0  }
   0x7   :  { %v145_v7 = vsel %vm144_vm0, %v143_v5, 0.0  ;;  %377 = vmatpush3.msra.mxu0 %v43_v6  ;;  %v40_v10 = vld [vmem:[%s550_s0] sm:$0xff]  ;;  %402 = vset.pattern.permute.xlu0 %v436_v11  ;;  %vm162_vm3 = vcmask 7168   ;;  %vm181_vm4 = vcmask 64512   ;;  %v258_v28 = vld [vmem:[%s559_s9 + $0x8] sm:$0xff]  ;;  %vm259_vm5 = vcmask 130048  }
   0x8   :  { %146 = vadd.xlane.f32.xlu0 %v145_v7  ;;  %378 = vmatprep.subr.mxu0 %v434_v4  ;;  %v180_v18 = vld [vmem:[%s557_s7] sm:$0xff]  ;;  %vm171_vm6 = vcmask 392192   ;;  %s438_s19 = smov [#allocation3]   ;;  %vm337_vm7 = vcmask 589184  }
   0x9   :  { %379 = vmatpush3.msra.mxu0 %v42_v8  ;;  %403 = vset.pattern.permute.xlu1 %v436_v11  ;;  %v360_v12 = vld [vmem:[#allocation2] ss:$0 sm:$0xff]  ;;  %s345_s20 = sshll.u32 %s438_s19, 4  ;;  %s346_s20 = int_to_ptr.vmem [resolvable:$true] %s345_s20 }
   0xa   :  { %380 = vmatprep.subr.mxu0 %v434_v4  ;;  %386 = vmatpush3.msra.mxu1 %v180_v18  ;;  %v357_v20 = vld [vmem:[%s554_s4] ss:$0 sm:$0xff]  ;;  %p417_p1 = scmp.lt.s32.totalorder %s346_s20, %s346_s20 }
   0xb   :  { %381 = vmatpush3.msra.mxu0 %v41_v9  ;;  %390 = vmatprep.subr.mxu1 %v434_v4  ;;  %v173_v25 = vld [vmem:[%s552_s2] sm:$0xff] }
   0xc   :  { %383 = vmatmul.mubr.msk.f32.vlgmr.msra.gmra.mxu0 %vm52_vm2, %v40_v10  ;;  %v257_v33 = vld [vmem:[%s559_s9] sm:$0xff]  ;;  %s437_s9 = smov 48  }
   0xd   :  { %v255_v34 = vld [vmem:[%s558_s8] sm:$0xff]  ;;  %s412_s8 = scalar_lea.vmem %s346_s20, 128 }
   0xe   :  { %p413_p0 = scmp.ne.s32.totalorder %s346_s20, %s412_s8  ;;  %p418_p2 = scmp.lt.s32.totalorder %s412_s8, %s412_s8 }
  0x10   :  { %p419_p3 = por %p418_p2, %p417_p1 }
  0x12   :  { %p420_p4 = pnand %p419_p3, %p413_p0 }
  0x91   :  { %v147_v13 = vpop.xlane.xlu0 %146 }
  0x92   :  { %v155_v14 = vadd.f32 %v360_v12, %v147_v13 }
  0x94   :  { %v361_v15 = vmul.f32 -1.442695, %v155_v14 }
  0x96   :  { %404 = vpow2.f32 %v361_v15 }
  0xa3   :  { %v405_v16 = vpop.eup %404 }
  0xa4   :  { %v159_v17 = vadd.f32 1.0, %v405_v16 }
  0xa6   :  { %406 = vrcp.f32 %v159_v17 }
  0xb3   :  { %v407_v19 = vpop.eup %406 }
  0xb4   :  { %163 = vst.msk [vmem:[%s561_s11] sm:$0xff] %vm162_vm3, %v407_v19  ;;  %176 = vperm.xlu0 %402, %v407_v19   ;;  %v164_v24 = vsub.f32 1.0, %v407_v19 }
  0xcc   :  { %v122_v21 = vpop.f32.mrf.mxu0 }
  0xcd   :  { %v123_v22 = vadd.f32 %v357_v20, %v122_v21 }
  0xce   :  { %v384_v23 = vpop.f32.mrf.mxu0 }
  0xcf   :  { %126 = vmax.xlane.f32.xlu1 %v123_v22 }
  0xe0   :  { %167 = vperm.xlu1 %403, %v164_v24  }
 0x12f   :  { %v177_v26 = vpop.permute.xlu0 %176 }
 0x130   :  { %v179_v27 = vmul.f32 %v177_v26, %v173_v25 }
 0x132   :  { %388 = vmatmul.mubr.msk.f32.vlgmr.msra.gmra.mxu1 %vm181_vm4, %v179_v27 }
 0x133   :  { %391 = vmatpush3.msra.mxu1 %v258_v28  ;;  %394 = vmatprep.mubr.msk.f32.mxu1 %vm435_vm1, %v434_v4 }
 0x134   :  { %392 = vmatprep.subr.mxu1 %v434_v4 }
 0x135   :  { %393 = vmatpush3.msra.mxu1 %v257_v33 }
 0x158   :  { %v127_v29 = vpop.xlane.xlu1 %126 }
 0x159   :  { %v128_v30 = vsub.f32 %v123_v22, %v127_v29 }
 0x15b   :  { %v129_v31 = vmul.f32 1.442695, %v128_v30 }
 0x15c   :  { %v168_v35 = vpop.permute.xlu1 %167 }
 0x15d   :  { %408 = vpow2.f32 %v129_v31 }
 0x16a   :  { %v409_v32 = vpop.eup %408 }
 0x16b   :  { %131 = vadd.xlane.f32.xlu1 %v409_v32 }
 0x1f2   :  { %v251_v36 = vpop.f32.mrf.mxu1 }
 0x1f3   :  { %v256_v37 = vmul.f32 %v255_v34, %v251_v36 }
 0x1f4   :  { %v389_v38 = vpop.f32.mrf.mxu1  ;;  %v132_v39 = vpop.xlane.xlu1 %131 }
 0x1f5   :  { %395 = vmatmul.mubr.msk.f32.vlgmr.msra.gmra.mxu1 %vm259_vm5, %v256_v37  ;;  %410 = vrcp.f32 %v132_v39 }
 0x202   :  { %v411_v40 = vpop.eup %410 }
 0x203   :  { %v134_v41 = vmul.f32 %v411_v40, %v409_v32 }
 0x205   :  { %v170_v42 = vmul.f32 %v168_v35, %v134_v41 }
 0x207   :  { %172 = vst.msk [vmem:[#allocation3] sm:$0xff] %vm171_vm6, %v170_v42 }
 0x2b5   :  { %v329_v43 = vpop.f32.mrf.mxu1 }
 0x2b6   :  { %334 = vrot.lane.b32.xlu1 %v329_v43, %s437_s9 }
 0x2b7   :  { %v396_v44 = vpop.f32.mrf.mxu1 }
 0x328   :  { %v335_v45 = vpop.permute.xlu1 %334 }
 0x329   :  { %338 = vst.msk [vmem:[#allocation3] sm:$0xff] %vm337_vm7, %v335_v45 }
 0x32a   :  { %423 = shalt.err (!%p420_p4)
}
 0x32b   :  { %348 = dma.vmem_to_hbm [thread:$0]  %s346_s20, 128, %s560_s10, [#allocation4]  }
 0x32c   :  { %432 = dma.done.wait [#allocation4], 128  }
 0x32d   :  { %433 = vsyncadd [#allocation4], 4294967168 }
 0x32e   :  { %356 = vsyncpa [#allocation4], 1 }

</bundles_post_ra>
